<compile_context>
chip_gen: v7x
topology: tpu7x:2x2x1
jax: 0.10.0
libtpu: 0.0.40
codegen_flags: <defaults>
</compile_context>

<pallas_src>
import functools

import jax
import jax.numpy as jnp
from jax.experimental import pallas as pl
from jax.experimental.pallas import tpu as pltpu

EPS = 1e-5  # PyTorch LayerNorm default eps


def _layernorm(x, g, b):
    mu = jnp.mean(x, axis=-1, keepdims=True)
    var = jnp.mean((x - mu) ** 2, axis=-1, keepdims=True)
    return (x - mu) * jax.lax.rsqrt(var + EPS) * g + b


# --------------------------------------------------------------------------
# Hardware-aware tiling helpers
# --------------------------------------------------------------------------
def _vmem_capacity_bytes():
    try:
        info = pltpu.get_tpu_info()
        for name in ("vmem_capacity_bytes", "vmem_bytes", "vmem_size_bytes"):
            cap = getattr(info, name, None)
            if cap:
                return int(cap)
    except Exception:
        pass
    return 64 * 1024 * 1024  # conservative default (v7x-sized VMEM)


def _stack_footprint_bytes(Bt, S, D, heads, dim_head, mlp_dim):
    """Rough per-grid-step VMEM footprint of the transformer-stack kernel."""
    inner = heads * dim_head
    M = Bt * S
    bf, f32 = 2, 4
    # double-buffered per-layer weight blocks (bf16 matmul weights + f32 vectors)
    w = (D * 3 * inner + inner * D + D * mlp_dim + mlp_dim * D) * bf
    w += (4 * D + 2 * D + mlp_dim) * f32
    w *= 2
    # double-buffered input activation block + resident activation scratch
    act = 3 * Bt * S * D * f32
    # live intermediates (x, ln, fused qkv, scores/probs, assembled pv, mlp hidden)
    inter = (2 * M * D * f32 + M * 3 * inner * bf + 4 * Bt * S * S * f32
             + M * inner * f32 + M * mlp_dim * (f32 + bf))
    return w + act + inter


def _choose_tile_and_vmem(B, S, D, heads, dim_head, mlp_dim):
    cap = _vmem_capacity_bytes()
    big_vmem = cap >= 100 * 1024 * 1024          # v5e / v6e (128 MiB VMEM)
    target_rows = 512 if big_vmem else 256       # bigger tiles amortize weight streaming
    Bt = max(1, min(B, target_rows // max(S, 1)))
    if not big_vmem and B >= 2:
        # v7x (2 TensorCores): keep >= 2 batch tiles so the "parallel" axis spans both.
        Bt = min(Bt, -(-B // 2))
    while Bt > 1 and B % Bt:
        Bt -= 1
    budget = (cap * 3) // 4
    while Bt > 1 and _stack_footprint_bytes(Bt, S, D, heads, dim_head, mlp_dim) > budget:
        Bt -= 1
        while Bt > 1 and B % Bt:
            Bt -= 1
    vmem_limit = int(min(cap * 7 // 8, 112 * 1024 * 1024))  # ~56 MiB on v7x, ~112 MiB on v5e/v6e
    return max(Bt, 1), vmem_limit


# --------------------------------------------------------------------------
# Kernel 1: patch embedding (Conv1d k=stride=p == matmul) + cls token + pos
#   Gridded over batch tiles; cls / patch / padded rows written with direct
#   slice stores (no concatenate); output already padded to S_pad rows.
# --------------------------------------------------------------------------
def embed_kernel(xp_ref, w_ref, b_ref, cls_ref, pos_ref, o_ref):
    Bte, N, CP = xp_ref.shape
    S_pad, D = o_ref.shape[1], o_ref.shape[2]
    n_valid = N + 1
    xp = xp_ref[...].reshape(Bte * N, CP)
    emb = jnp.dot(xp.astype(jnp.bfloat16), w_ref[...],
                  preferred_element_type=jnp.float32) + b_ref[...]
    emb = emb.reshape(Bte, N, D)
    o_ref[:, 0:1, :] = jnp.broadcast_to((cls_ref[...] + pos_ref[0:1, :])[None, :, :],
                                        (Bte, 1, D))
    o_ref[:, 1:n_valid, :] = emb + pos_ref[1:n_valid, :][None, :, :]
    if S_pad > n_valid:  # zero the padded rows (masked out of attention later)
        o_ref[:, n_valid:, :] = jnp.zeros((Bte, S_pad - n_valid, D), jnp.float32)


def patch_embed_and_pos(xp, w_pe, b_pe, cls_tok, pos, s_pad):
    B, N, CP = xp.shape
    D = w_pe.shape[1]
    per_sample = (N * CP + s_pad * D + N * D) * 4
    Bte = max(1, min(B, (4 * 1024 * 1024) // max(per_sample, 1)))
    while Bte > 1 and B % Bte:
        Bte -= 1
    nbe = B // Bte
    return pl.pallas_call(
        embed_kernel,
        out_shape=jax.ShapeDtypeStruct((B, s_pad, D), jnp.float32),
        grid=(nbe,),
        in_specs=[
            pl.BlockSpec((Bte, N, CP), lambda b: (b, 0, 0)),
            pl.BlockSpec(w_pe.shape, lambda b: (0, 0)),
            pl.BlockSpec(b_pe.shape, lambda b: (0, 0)),
            pl.BlockSpec(cls_tok.shape, lambda b: (0, 0)),
            pl.BlockSpec(pos.shape, lambda b: (0, 0)),
        ],
        out_specs=pl.BlockSpec((Bte, s_pad, D), lambda b: (b, 0, 0)),
        compiler_params=pltpu.CompilerParams(dimension_semantics=("parallel",)),
    )(xp, w_pe, b_pe, cls_tok, pos)


# --------------------------------------------------------------------------
# Kernel 2: full transformer stack (all layers) in one pallas_call.
#   grid = (batch_tiles, depth); activation resident in a VMEM scratch across
#   the layer axis; only the cls row is written back at the last layer.
# --------------------------------------------------------------------------
def stack_kernel(x_ref, g1_ref, b1_ref, wqkv_ref, wo_ref, bo_ref,
                 g2_ref, b2_ref, w1_ref, bm1_ref, w2_ref, bm2_ref,
                 cls_ref, act_ref, *, heads, dim_head, s_valid, approx_gelu):
    layer = pl.program_id(1)

    @pl.when(layer == 0)
    def _():
        act_ref[...] = x_ref[...]        # initialize the resident activation

    Bt, S, D = act_ref.shape
    M = Bt * S                           # S padded to a multiple of 8 -> aligned merge
    inner = heads * dim_head
    x = act_ref[...].reshape(M, D)

    # ---- attention branch (pre-norm) ----
    h = _layernorm(x, g1_ref[0], b1_ref[0]).astype(jnp.bfloat16)
    # One fused QKV matmul (scale already folded into the Q weight columns);
    # bf16 output keeps q/k/v intermediates half-width.
    qkv = jnp.dot(h, wqkv_ref[0], preferred_element_type=jnp.bfloat16)   # (M, 3*inner)

    kmask = None
    if S > s_valid:  # mask padded key positions before softmax
        kmask = jax.lax.broadcasted_iota(jnp.int32, (1, 1, S), 2) < s_valid

    outs = []
    for hd in range(heads):              # only the small SxS einsums remain per-head
        q = qkv[:, hd * dim_head:(hd + 1) * dim_head].reshape(Bt, S, dim_head)
        k = qkv[:, inner + hd * dim_head: inner + (hd + 1) * dim_head].reshape(Bt, S, dim_head)
        v = qkv[:, 2 * inner + hd * dim_head: 2 * inner + (hd + 1) * dim_head].reshape(Bt, S, dim_head)
        s = jnp.einsum('bqd,bkd->bqk', q, k, preferred_element_type=jnp.float32)
        if kmask is not None:
            s = jnp.where(kmask, s, jnp.float32(-1e30))
        s = s - jnp.max(s, axis=-1, keepdims=True)
        p = jnp.exp(s)
        p = p * pl.reciprocal(jnp.sum(p, axis=-1, keepdims=True), approx=True)
        o = jnp.einsum('bqk,bkd->bqd', p.astype(jnp.bfloat16), v,
                       preferred_element_type=jnp.float32)
        outs.append(o.reshape(M, dim_head).astype(jnp.bfloat16))
    pv = jnp.concatenate(outs, axis=-1)                                  # (M, inner) bf16
    # single full-depth output projection (K = inner) instead of per-head accumulation
    attn = jnp.dot(pv, wo_ref[0], preferred_element_type=jnp.float32) + bo_ref[0]
    x = x + attn

    # ---- MLP branch (pre-norm) ----
    h2 = _layernorm(x, g2_ref[0], b2_ref[0]).astype(jnp.bfloat16)
    m = jnp.dot(h2, w1_ref[0], preferred_element_type=jnp.float32) + bm1_ref[0]
    m = jax.nn.gelu(m, approximate=approx_gelu)   # default False == PyTorch exact erf GELU
    m = jnp.dot(m.astype(jnp.bfloat16), w2_ref[0],
                preferred_element_type=jnp.float32) + bm2_ref[0]
    x = x + m

    x3 = x.reshape(Bt, S, D)
    act_ref[...] = x3

    @pl.when(layer == pl.num_programs(1) - 1)
    def _():
        cls_ref[...] = x3[:, 0:1, :]     # only the cls row ever leaves VMEM


def transformer_stack(x, stacked, heads, dim_head, s_valid, approx_gelu=False):
    B, S, D = x.shape
    depth = stacked["wqkv"].shape[0]
    mlp_dim = stacked["w1"].shape[-1]
    Bt, vmem_limit = _choose_tile_and_vmem(B, S, D, heads, dim_head, mlp_dim)
    nb = B // Bt

    def wspec(arr):
        nd = arr.ndim
        return pl.BlockSpec((1,) + arr.shape[1:],
                            lambda b, l, _nd=nd: (l,) + (0,) * (_nd - 1))

    kernel = functools.partial(stack_kernel, heads=heads, dim_head=dim_head,
                               s_valid=s_valid, approx_gelu=approx_gelu)
    # NOTE(v5e): if a profile shows exposed weight DMA, add
    # pipeline_mode=pl.Buffered(3) to the wqkv / w1 / w2 specs below.
    return pl.pallas_call(
        kernel,
        out_shape=jax.ShapeDtypeStruct((B, 1, D), jnp.float32),
        grid=(nb, depth),
        in_specs=[
            pl.BlockSpec((Bt, S, D), lambda b, l: (b, 0, 0)),
            wspec(stacked["g1"]), wspec(stacked["b1"]),
            wspec(stacked["wqkv"]), wspec(stacked["wo"]), wspec(stacked["bo"]),
            wspec(stacked["g2"]), wspec(stacked["b2"]),
            wspec(stacked["w1"]), wspec(stacked["bm1"]),
            wspec(stacked["w2"]), wspec(stacked["bm2"]),
        ],
        out_specs=pl.BlockSpec((Bt, 1, D), lambda b, l: (b, 0, 0)),
        scratch_shapes=[pltpu.VMEM((Bt, S, D), jnp.float32)],
        compiler_params=pltpu.CompilerParams(
            dimension_semantics=("parallel", "arbitrary"),
            vmem_limit_bytes=vmem_limit,
        ),
    )(x, stacked["g1"], stacked["b1"], stacked["wqkv"], stacked["wo"], stacked["bo"],
      stacked["g2"], stacked["b2"], stacked["w1"], stacked["bm1"],
      stacked["w2"], stacked["bm2"])


# --------------------------------------------------------------------------
# Kernel 3: LayerNorm + Linear head + log_softmax on the cls row only
# --------------------------------------------------------------------------
def head_kernel(cls_ref, g_ref, b_ref, w_ref, bh_ref, o_ref):
    h = _layernorm(cls_ref[...], g_ref[...], b_ref[...])
    logits = jnp.dot(h.astype(jnp.bfloat16), w_ref[...],
                     preferred_element_type=jnp.float32) + bh_ref[...]
    z = logits - jnp.max(logits, axis=-1, keepdims=True)
    o_ref[...] = z - jnp.log(jnp.sum(jnp.exp(z), axis=-1, keepdims=True))


def classifier_head(cls_x, g_h, b_h, w_h, bias_h):
    B = cls_x.shape[0]
    num_classes = w_h.shape[1]
    return pl.pallas_call(
        head_kernel,
        out_shape=jax.ShapeDtypeStruct((B, num_classes), jnp.float32),
    )(cls_x, g_h, b_h, w_h, bias_h)


# --------------------------------------------------------------------------
# Full forward pass
# --------------------------------------------------------------------------
def mvts_transformer_forward(mvts, params, approx_gelu=False):
    B, C, L = mvts.shape
    p = params["patch_size"]
    N = L // p
    s_valid = N + 1
    s_pad = -(-s_valid // 8) * 8       # pad seq to a multiple of 8 (sublane aligned)
    # glue: extract non-overlapping patches, flatten (channel, within-patch) dims
    xp = mvts.reshape(B, C, N, p).transpose(0, 2, 1, 3).reshape(B, N, C * p)
    x = patch_embed_and_pos(xp, params["w_pe"], params["b_pe"],
                            params["cls"], params["pos"], s_pad)
    # emb_dropout / dropout are 0.0 in eval -> no-op
    cls3 = transformer_stack(x, params["stack"], params["heads"], params["dim_head"],
                             s_valid, approx_gelu=approx_gelu)
    cls_x = cls3.reshape(B, -1)        # stack kernel already emitted only the cls row
    return classifier_head(cls_x, params["g_h"], params["b_h"],
                           params["w_h"], params["bias_h"])


# --------------------------------------------------------------------------
# Deterministic parameter init (trunc-normal std=0.02, LN = (1, 0), bias = 0).
# Matmul weights stored bf16 (MXU operands); LN/bias/pos/cls stay f32.
# The attention scale dim_head**-0.5 is folded into the Q weight columns.
# --------------------------------------------------------------------------
def trunc_normal(key, shape, std=0.02):
    return std * jax.random.truncated_normal(key, -2.0, 2.0, shape, jnp.float32)


def init_params(key, *, num_channels, patch_size, num_patches, dim, depth,
                heads, dim_head, mlp_dim, num_classes):
    inner = heads * dim_head
    keys = jax.random.split(key, 4 + depth * 4)
    ki = iter(keys)
    wdt = jnp.bfloat16
    scale = dim_head ** -0.5

    params = {
        "patch_size": patch_size,
        "heads": heads,
        "dim_head": dim_head,
        "w_pe": trunc_normal(next(ki), (num_channels * patch_size, dim)).astype(wdt),
        "b_pe": jnp.zeros((1, dim), jnp.float32),
        "cls": trunc_normal(next(ki), (1, dim)),
        "pos": trunc_normal(next(ki), (num_patches + 1, dim)),
        "g_h": jnp.ones((1, dim), jnp.float32),
        "b_h": jnp.zeros((1, dim), jnp.float32),
        "w_h": trunc_normal(next(ki), (dim, num_classes)).astype(wdt),
        "bias_h": jnp.zeros((1, num_classes), jnp.float32),
    }

    g1, b1, wqkv, wo, bo = [], [], [], [], []
    g2, b2, w1, bm1, w2, bm2 = [], [], [], [], [], []
    for _ in range(depth):
        wqkv_l = trunc_normal(next(ki), (dim, 3 * inner))     # qkv_bias=False
        q_w, k_w, v_w = jnp.split(wqkv_l, 3, axis=1)
        wqkv.append(jnp.concatenate([q_w * scale, k_w, v_w], axis=1).astype(wdt))
        wo.append(trunc_normal(next(ki), (inner, dim)).astype(wdt))
        w1.append(trunc_normal(next(ki), (dim, mlp_dim)).astype(wdt))
        w2.append(trunc_normal(next(ki), (mlp_dim, dim)).astype(wdt))
        g1.append(jnp.ones((1, dim), jnp.float32)); b1.append(jnp.zeros((1, dim), jnp.float32))
        g2.append(jnp.ones((1, dim), jnp.float32)); b2.append(jnp.zeros((1, dim), jnp.float32))
        bo.append(jnp.zeros((1, dim), jnp.float32))
        bm1.append(jnp.zeros((1, mlp_dim), jnp.float32))
        bm2.append(jnp.zeros((1, dim), jnp.float32))

    params["stack"] = {
        "g1": jnp.stack(g1), "b1": jnp.stack(b1),
        "wqkv": jnp.stack(wqkv), "wo": jnp.stack(wo), "bo": jnp.stack(bo),
        "g2": jnp.stack(g2), "b2": jnp.stack(b2),
        "w1": jnp.stack(w1), "bm1": jnp.stack(bm1),
        "w2": jnp.stack(w2), "bm2": jnp.stack(bm2),
    }
    return params


if __name__ == "__main__":
    # small config: mvts_length=16, patch_size=4 -> num_patches=4, seq=5 (padded to 8)
    B, C, L = 2, 4, 16
    patch_size = 4
    num_patches = L // patch_size
    dim, depth, heads, dim_head, mlp_dim, num_classes = 32, 2, 4, 16, 64, 5

    key = jax.random.PRNGKey(0)
    k_data, k_params = jax.random.split(key)
    mvts = jax.random.normal(k_data, (B, C, L), jnp.float32)

    params = init_params(k_params, num_channels=C, patch_size=patch_size,
                         num_patches=num_patches, dim=dim, depth=depth,
                         heads=heads, dim_head=dim_head, mlp_dim=mlp_dim,
                         num_classes=num_classes)

    out = mvts_transformer_forward(mvts, params)
    out = jax.block_until_ready(out)

    assert out.shape == (B, num_classes)
    assert bool(jnp.all(jnp.isfinite(out)))
    # log_softmax rows should exponentiate-sum to ~1
    assert bool(jnp.allclose(jnp.sum(jnp.exp(out), axis=1), 1.0, atol=1e-5))
    print("KERNEL_OK")
</pallas_src>

<mosaic_0001>
module attributes {stable_mosaic.version = 11 : i64} {
  func.func @embed_kernel(%arg0: i32, %arg1: memref<2x4x16xf32, #tpu.memory_space<vmem>>, %arg2: memref<16x32xbf16, #tpu.memory_space<vmem>>, %arg3: memref<1x32xf32, #tpu.memory_space<vmem>>, %arg4: memref<1x32xf32, #tpu.memory_space<vmem>>, %arg5: memref<5x32xf32, #tpu.memory_space<vmem>>, %arg6: memref<2x8x32xf32, #tpu.memory_space<vmem>>) attributes {dimension_semantics = [#tpu.dimension_semantics<parallel>], iteration_bounds = array<i64: 1>, scalar_prefetch = 0 : i64, scratch_operands = 0 : i64, tpu.core_type = #tpu.core_type<tc>, window_params = [{transform_indices = @transform_0, window_bounds = array<i64: 2, 4, 16>}, {pipeline_mode = #tpu.pipeline_mode<synchronous>, transform_indices = @transform_1, window_bounds = array<i64: 16, 32>}, {pipeline_mode = #tpu.pipeline_mode<synchronous>, transform_indices = @transform_2, window_bounds = array<i64: 1, 32>}, {pipeline_mode = #tpu.pipeline_mode<synchronous>, transform_indices = @transform_3, window_bounds = array<i64: 1, 32>}, {pipeline_mode = #tpu.pipeline_mode<synchronous>, transform_indices = @transform_4, window_bounds = array<i64: 5, 32>}, {transform_indices = @transform_5, window_bounds = array<i64: 2, 8, 32>}]} {
    %c0 = arith.constant 0 : index
    %c0_0 = arith.constant 0 : index
    %c0_1 = arith.constant 0 : index
    %0 = vector.load %arg1[%c0, %c0_0, %c0_1] : memref<2x4x16xf32, #tpu.memory_space<vmem>>, vector<2x4x16xf32>
    %1 = vector.shape_cast %0 : vector<2x4x16xf32> to vector<8x16xf32>
    %2 = arith.truncf %1 : vector<8x16xf32> to vector<8x16xbf16>
    %c0_2 = arith.constant 0 : index
    %c0_3 = arith.constant 0 : index
    %3 = vector.load %arg2[%c0_2, %c0_3] : memref<16x32xbf16, #tpu.memory_space<vmem>>, vector<16x32xbf16>
    %cst = arith.constant dense<0.000000e+00> : vector<8x32xf32>
    %4 = tpu.matmul %2, %3, %cst {dimension_numbers = #tpu.dot_dimension_numbers<[1], [0], [0], [1], [0, 0, 1, 1], [], []>} : vector<8x16xbf16>, vector<16x32xbf16>, vector<8x32xf32> -> vector<8x32xf32>
    %c0_4 = arith.constant 0 : index
    %c0_5 = arith.constant 0 : index
    %5 = vector.load %arg3[%c0_4, %c0_5] : memref<1x32xf32, #tpu.memory_space<vmem>>, vector<1x32xf32>
    %6 = vector.broadcast %5 : vector<1x32xf32> to vector<8x32xf32>
    %7 = arith.addf %4, %6 : vector<8x32xf32>
    %8 = vector.shape_cast %7 : vector<8x32xf32> to vector<2x4x32xf32>
    %c0_6 = arith.constant 0 : index
    %c0_7 = arith.constant 0 : index
    %9 = vector.load %arg4[%c0_6, %c0_7] : memref<1x32xf32, #tpu.memory_space<vmem>>, vector<1x32xf32>
    %c0_8 = arith.constant 0 : index
    %c0_9 = arith.constant 0 : index
    %10 = vector.load %arg5[%c0_8, %c0_9] : memref<5x32xf32, #tpu.memory_space<vmem>>, vector<1x32xf32>
    %11 = arith.addf %9, %10 : vector<1x32xf32>
    %12 = vector.shape_cast %11 : vector<1x32xf32> to vector<1x1x32xf32>
    %13 = vector.shape_cast %12 : vector<1x1x32xf32> to vector<1x1x32xf32>
    %14 = vector.broadcast %13 : vector<1x1x32xf32> to vector<2x1x32xf32>
    %c0_10 = arith.constant 0 : index
    %c0_11 = arith.constant 0 : index
    %c0_12 = arith.constant 0 : index
    %15 = vector.load %arg6[%c0_10, %c0_11, %c0_12] : memref<2x8x32xf32, #tpu.memory_space<vmem>>, vector<2x1x32xf32>
    tpu.vector_store %arg6[%c0_10, %c0_11, %c0_12], %14 {strides = array<i32>} : memref<2x8x32xf32, #tpu.memory_space<vmem>>, vector<2x1x32xf32>,
    %c1 = arith.constant 1 : index
    %c0_13 = arith.constant 0 : index
    %16 = vector.load %arg5[%c1, %c0_13] : memref<5x32xf32, #tpu.memory_space<vmem>>, vector<4x32xf32>
    %17 = vector.shape_cast %16 : vector<4x32xf32> to vector<1x4x32xf32>
    %18 = vector.broadcast %17 : vector<1x4x32xf32> to vector<2x4x32xf32>
    %19 = arith.addf %8, %18 : vector<2x4x32xf32>
    %c0_14 = arith.constant 0 : index
    %c1_15 = arith.constant 1 : index
    %c0_16 = arith.constant 0 : index
    %20 = vector.load %arg6[%c0_14, %c1_15, %c0_16] : memref<2x8x32xf32, #tpu.memory_space<vmem>>, vector<2x4x32xf32>
    tpu.vector_store %arg6[%c0_14, %c1_15, %c0_16], %19 {strides = array<i32>} : memref<2x8x32xf32, #tpu.memory_space<vmem>>, vector<2x4x32xf32>,
    %cst_17 = arith.constant 0.000000e+00 : f32
    %21 = vector.broadcast %cst_17 : f32 to vector<2x3x32xf32>
    %c0_18 = arith.constant 0 : index
    %c5 = arith.constant 5 : index
    %c0_19 = arith.constant 0 : index
    %22 = vector.load %arg6[%c0_18, %c5, %c0_19] : memref<2x8x32xf32, #tpu.memory_space<vmem>>, vector<2x3x32xf32>
    tpu.vector_store %arg6[%c0_18, %c5, %c0_19], %21 {strides = array<i32>} : memref<2x8x32xf32, #tpu.memory_space<vmem>>, vector<2x3x32xf32>,
    return
  }
  func.func @transform_0(%arg0: i32) -> (i32, i32, i32) {
    %c0_i32 = arith.constant 0 : i32
    %c0_i32_0 = arith.constant 0 : i32
    %c0_i32_1 = arith.constant 0 : i32
    return %arg0, %c0_i32, %c0_i32_0 : i32, i32, i32
  }
  func.func @transform_1(%arg0: i32) -> (i32, i32) {
    %c0_i32 = arith.constant 0 : i32
    %c0_i32_0 = arith.constant 0 : i32
    %c0_i32_1 = arith.constant 0 : i32
    return %c0_i32, %c0_i32_0 : i32, i32
  }
  func.func @transform_2(%arg0: i32) -> (i32, i32) {
    %c0_i32 = arith.constant 0 : i32
    %c0_i32_0 = arith.constant 0 : i32
    %c0_i32_1 = arith.constant 0 : i32
    return %c0_i32, %c0_i32_0 : i32, i32
  }
  func.func @transform_3(%arg0: i32) -> (i32, i32) {
    %c0_i32 = arith.constant 0 : i32
    %c0_i32_0 = arith.constant 0 : i32
    %c0_i32_1 = arith.constant 0 : i32
    return %c0_i32, %c0_i32_0 : i32, i32
  }
  func.func @transform_4(%arg0: i32) -> (i32, i32) {
    %c0_i32 = arith.constant 0 : i32
    %c0_i32_0 = arith.constant 0 : i32
    %c0_i32_1 = arith.constant 0 : i32
    return %c0_i32, %c0_i32_0 : i32, i32
  }
  func.func @transform_5(%arg0: i32) -> (i32, i32, i32) {
    %c0_i32 = arith.constant 0 : i32
    %c0_i32_0 = arith.constant 0 : i32
    %c0_i32_1 = arith.constant 0 : i32
    return %arg0, %c0_i32, %c0_i32_0 : i32, i32, i32
  }
}

</mosaic_0001>

<bundles_post_ra>
// kernel: tpu_custom_call.1
= control target key start
LH: loop header
LB: loop body
LE: loop exit
PB: predicated region body
PF: predicated region fallthrough
CT: control target
= control target key end

     0   :  { %10 = vsyncpa [#allocation3], 0  ;;  %s333_s0 = inlined_call_operand.hbm [shape: f32[2,4,16], index: 0, kind: input, shape index: {}]   ;;  %s334_s1 = inlined_call_operand.hbm [shape: bf16[16,32], index: 1, kind: input, shape index: {}]   ;;  %s335_s2 = inlined_call_operand.vmem [shape: f32[1,32], index: 2, kind: input, shape index: {}]   ;;  %s336_s3 = inlined_call_operand.vmem [shape: f32[1,32], index: 3, kind: input, shape index: {}]   ;;  %s337_s4 = inlined_call_operand.vmem [shape: f32[5,32], index: 4, kind: input, shape index: {}]   ;;  %s338_s5 = inlined_call_operand.hbm [shape: f32[2,8,32], index: 5, kind: output, shape index: {}]  }
   0x1   :  { %11 = vsyncpa [#allocation6], 0 }
   0x2   :  { %12 = vsyncpa [#allocation4], 0  ;;  %s246_s18 = smov [#allocation2]   ;;  %s174_s22 = scalar_lea.hbm %s333_s0, 128 }
   0x3   :  { %s18_s19 = sshll.u32 %s246_s18, 4  ;;  %p175_p0 = scmp.ne.s32.totalorder %s333_s0, %s174_s22  ;;  %s19_s19 = int_to_ptr.vmem [resolvable:$true] %s18_s19 }
   0x4   :  { %p178_p1 = scmp.lt.u32.totalorder %s174_s22, %s333_s0 }
   0x6   :  { %p180_p2 = pnand %p178_p1, %p175_p0 }
   0x8   :  { %183 = shalt.err (!%p180_p2)
}
   0x9   :  { %s184_s27 = scalar_lea.vmem %s19_s19, 128  ;;  %p189_p4 = scmp.lt.s32.totalorder %s19_s19, %s19_s19 }
   0xa   :  { %p185_p3 = scmp.ne.s32.totalorder %s19_s19, %s184_s27  ;;  %p190_p5 = scmp.lt.s32.totalorder %s184_s27, %s184_s27 }
   0xc   :  { %p191_p6 = por %p190_p5, %p189_p4 }
   0xe   :  { %p192_p7 = pnand %p191_p6, %p185_p3 }
  0x10   :  { %195 = shalt.err (!%p192_p7)
}
  0x11   :  { %s247_s28 = smov 64   ;;  %s248_s29 = smov 4  }
  0x12   :  { %24 = dma.hbm_to_vmem [thread:$0]  %s333_s0, 128, %s19_s19, [#allocation3], %s247_s28, %s247_s28, %s248_s29  }
  0x13   :  { %s249_s7 = smov [#allocation5]   ;;  %s196_s11 = scalar_lea.hbm %s334_s1, 128 }
  0x14   :  { %s30_s8 = sshll.u32 %s249_s7, 4  ;;  %p197_p8 = scmp.ne.s32.totalorder %s334_s1, %s196_s11  ;;  %s31_s8 = int_to_ptr.vmem [resolvable:$true] %s30_s8 }
  0x15   :  { %p200_p9 = scmp.lt.u32.totalorder %s196_s11, %s334_s1 }
  0x17   :  { %p202_p10 = pnand %p200_p9, %p197_p8 }
  0x19   :  { %205 = shalt.err (!%p202_p10)
}
  0x1a   :  { %s206_s16 = scalar_lea.vmem %s31_s8, 128  ;;  %p211_p12 = scmp.lt.s32.totalorder %s31_s8, %s31_s8 }
  0x1b   :  { %p207_p11 = scmp.ne.s32.totalorder %s31_s8, %s206_s16  ;;  %p212_p13 = scmp.lt.s32.totalorder %s206_s16, %s206_s16 }
  0x1d   :  { %p213_p0 = por %p212_p13, %p211_p12 }
  0x1f   :  { %p214_p1 = pnand %p213_p0, %p207_p11 }
  0x21   :  { %217 = shalt.err (!%p214_p1)
}
  0x22   :  { %36 = dma.hbm_to_vmem [thread:$0]  %s334_s1, 128, %s31_s8, [#allocation6], %s247_s28, %s247_s28, %s248_s29  }
  0x23   :  { %240 = dma.done.wait [#allocation3], 128  }
  0x24   :  { %241 = vsyncadd [#allocation3], 4294967168 }
  0x25   :  { %242 = dma.done.wait [#allocation6], 128  }
  0x26   :  { %243 = vsyncadd [#allocation6], 4294967168  ;;  %vm131_vm0 = vcmask 256000   ;;  %v250_v0 = vmov 0.0   ;;  %vm251_vm1 = vmmov 0   ;;  %v172_v1 = vld [vmem:[#allocation5] sm:$0xff]  }
  0x27   :  { %157 = vmatprep.subr.bf16.mxu0 %v250_v0  ;;  %132 = vst.msk [vmem:[#allocation7 + $0x5] sm:$0x7] %vm131_vm0, %v250_v0  ;;  %133 = vst.msk [vmem:[#allocation7 + $0xd] sm:$0x7] %vm131_vm0, %v250_v0  ;;  %159 = vmatprep.mubr.msk.bf16.mxu0 %vm251_vm1, %v250_v0  ;;  %v173_v2 = vld [vmem:[#allocation2] sm:$0xff]   ;;  %vm72_vm2 = vcmask 130048  }
  0x28   :  { %158 = vmatpush3.bf16.msra.mxu0 %v172_v1  ;;  %v56_v3 = vpack.c.bf16 %v173_v2, %v173_v2  ;;  %v119_v4 = vld [vmem:[%s336_s3] sm:$0x1]  ;;  %vm122_vm3 = vcmask 253952   ;;  %v125_v9 = vld [vmem:[%s337_s4 + $0x1] sm:$0xf]  ;;  %s252_s3 = smov [#allocation7]  }
  0x29   :  { %v120_v5 = vld [vmem:[%s337_s4] sm:$0x1]  ;;  %s139_s25 = sshll.u32 %s252_s3, 4  ;;  %vm128_vm4 = vcmask 257024   ;;  %s140_s25 = int_to_ptr.vmem [resolvable:$true] %s139_s25 }
  0x2a   :  { %v121_v6 = vadd.f32 %v120_v5, %v119_v4  ;;  %v152_v7 = vld [vmem:[%s335_s2] ss:$0 sm:$0xff]  ;;  %s218_s26 = scalar_lea.vmem %s140_s25, 256  ;;  %p223_p3 = scmp.lt.s32.totalorder %s140_s25, %s140_s25 }
  0x2b   :  { %160 = vmatmul.mubr.msk.bf16.vlgmr.msra.gmra.mrb[0].mxu0 %vm72_vm2, %v56_v3  ;;  %p219_p2 = scmp.ne.s32.totalorder %s140_s25, %s218_s26  ;;  %p224_p4 = scmp.lt.s32.totalorder %s218_s26, %s218_s26 }
  0x2c   :  { %123 = vst.msk [vmem:[#allocation7] sm:$0x1] %vm122_vm3, %v121_v6  ;;  %124 = vst.msk [vmem:[#allocation7 + $0x8] sm:$0x1] %vm122_vm3, %v121_v6 }
  0x2d   :  { %p225_p5 = por %p224_p4, %p223_p3 }
  0x2f   :  { %p226_p6 = pnand %p225_p5, %p219_p2 }
  0xfe   :  { %v110_v8 = vpop.f32.mrb[0].mxu0 }
  0xff   :  { %v111_v10 = vadd.f32 %v152_v7, %v110_v8  ;;  %v161_v11 = vpop.f32.mrb[1].mxu0 }
 0x100   :  { %v113_v12 = vpop.f32.mrb[2].mxu0 }
 0x101   :  { %v117_v13 = vcombine.high %v111_v10, %v111_v10  ;;  %v126_v14 = vadd.f32 %v125_v9, %v111_v10  ;;  %v162_v15 = vpop.f32.mrb[3].mxu0 }
 0x103   :  { %v127_v16 = vadd.f32 %v125_v9, %v117_v13  ;;  %129 = vst.msk [vmem:[#allocation7 + $0x1] sm:$0xf] %vm128_vm4, %v126_v14 }
 0x105   :  { %130 = vst.msk [vmem:[#allocation7 + $0x9] sm:$0xf] %vm128_vm4, %v127_v16 }
 0x106   :  { %229 = shalt.err (!%p226_p6)
}
 0x107   :  { %s230_s27 = scalar_lea.hbm %s338_s5, 256 }
 0x108   :  { %p231_p7 = scmp.ne.s32.totalorder %s338_s5, %s230_s27  ;;  %p234_p8 = scmp.lt.u32.totalorder %s230_s27, %s338_s5 }
 0x10a   :  { %p236_p9 = pnand %p234_p8, %p231_p7 }
 0x10c   :  { %239 = shalt.err (!%p236_p9)
}
 0x10d   :  { %s253_s7 = smov 128   ;;  %s254_s8 = smov 8  }
 0x10e   :  { %145 = dma.vmem_to_hbm [thread:$0]  %s140_s25, 256, %s338_s5, [#allocation4], %s253_s7, %s253_s7, %s254_s8  }
 0x10f   :  { %244 = dma.done.wait [#allocation4], 256  }
 0x110   :  { %245 = vsyncadd [#allocation4], 4294967040 }
 0x111   :  { %149 = vsyncpa [#allocation3], 1 }
 0x112   :  { %150 = vsyncpa [#allocation6], 1 }
 0x113   :  { %151 = vsyncpa [#allocation4], 1 }

</bundles_post_ra>
